<compile_context>
chip_gen: v6e
topology: v6e:2x2x1
jax: 0.10.0
libtpu: 0.0.40
codegen_flags: <defaults>
</compile_context>

<pallas_src>
import jax
import jax.numpy as jnp
from jax.experimental import pallas as pl
from jax.experimental.pallas import tpu as pltpu

LANES = 128
K_IN = 10    # fc1 input features
N_OUT = 2    # fc1 output features


def net_kernel(x_ref, w_ref, db_ref, p0_ref, p1_ref):
    # x_ref: (tr, 1280) -- 128 batch rows live in the lane dim of each z row
    # w_ref: (1280, 128) block-diagonal weight; z[i, j] = x[128*i + j] . dw
    z = jnp.dot(x_ref[...], w_ref[...], preferred_element_type=jnp.float32)
    z = z + db_ref[0, 0]                      # scalar bias diff from SMEM

    # 2-way softmax == sigmoid of the logit difference.  Single exp; the
    # reciprocal goes to the EUP vrcp slot (approx=True, effectively free).
    # Overflow-safe: exp(-z) -> inf -> 1+inf -> inf -> rcp -> 0 (no NaN).
    e = jnp.exp(-z)
    p1 = pl.reciprocal(1.0 + e, approx=True)
    p0 = 1.0 - p1                             # NOT e/(1+e): inf/inf -> NaN

    p0_ref[...] = p0.astype(p0_ref.dtype)     # fully lane-dense stores
    p1_ref[...] = p1.astype(p1_ref.dtype)


def _round_up(a, m):
    return -(-a // m) * m


def net_forward(x, w, b, *, rows_per_tile=512):
    """x: (B, 10), w: (10, 2), b: (2,)  ->  softmax(x @ w + b, axis=-1)."""
    B, K = x.shape
    N = w.shape[1]
    assert K == K_IN and w.shape == (K, N) and b.shape == (N,) and N == N_OUT

    # Fold the 2-class structure: only the logit difference matters.
    dw = (w[:, 1] - w[:, 0]).astype(jnp.float32)                  # (10,)
    db = (b[1] - b[0]).reshape(1, 1).astype(jnp.float32)          # (1, 1)
    # Block-diagonal weight: column j holds dw in rows 10j..10j+9.
    w_blk = (jnp.eye(LANES, dtype=jnp.float32)[:, None, :]
             * dw[None, :, None]).reshape(K * LANES, LANES)       # (1280, 128)

    # Lane alignment: the dense reshape needs B % 128 == 0.  Aligned batches
    # reshape for free (contiguous bitcast); ragged batches pad by <128 rows.
    # The old tile-multiple pad is gone: partial row-tiles are handled by the
    # cdiv grid with masked tail reads/writes.
    Bp = _round_up(B, LANES)
    xp = x if Bp == B else jnp.pad(x, ((0, Bp - B), (0, 0)))
    R = Bp // LANES
    xd = xp.reshape(R, K * LANES)                                 # (R, 1280)

    # Row-group tiling: multiple of 8 sublanes, capped for VMEM, and >=2 grid
    # steps when possible so both v7x TensorCores get work.
    if R <= 8:
        tr = R                                    # single tile (== full extent)
    else:
        tr = min(_round_up(rows_per_tile, 8), _round_up(pl.cdiv(R, 2), 8))
    n_tiles = pl.cdiv(R, tr)      # partial last tile masked by Pallas

    out_dtype = x.dtype
    p0, p1 = pl.pallas_call(
        net_kernel,
        out_shape=(jax.ShapeDtypeStruct((R, LANES), out_dtype),
                   jax.ShapeDtypeStruct((R, LANES), out_dtype)),
        grid=(n_tiles,),
        in_specs=[
            pl.BlockSpec((tr, K * LANES), lambda i: (i, 0)),      # x row-groups
            pl.BlockSpec((K * LANES, LANES), lambda i: (0, 0)),   # resident W
            pl.BlockSpec((1, 1), lambda i: (0, 0),
                         memory_space=pltpu.SMEM),                # scalar db
        ],
        out_specs=(
            pl.BlockSpec((tr, LANES), lambda i: (i, 0)),          # p0 (dense)
            pl.BlockSpec((tr, LANES), lambda i: (i, 0)),          # p1 (dense)
        ),
        compiler_params=pltpu.CompilerParams(
            dimension_semantics=("parallel",)),
    )(xd, w_blk, db)

    # Cheap wrapper assembly of (B, 2) from the two lane-dense planes.
    return jnp.stack([p0.reshape(-1)[:B], p1.reshape(-1)[:B]], axis=-1)


if __name__ == "__main__":
    key = jax.random.PRNGKey(0)
    kx, kw, kb, kx2 = jax.random.split(key, 4)

    B, IN, OUT = 8, 10, 2   # nn.Linear(10, 2)

    x = jax.random.normal(kx, (B, IN), dtype=jnp.float32)
    # Deterministic init mimicking nn.Linear's uniform(-1/sqrt(in), 1/sqrt(in)).
    bound = 1.0 / jnp.sqrt(jnp.float32(IN))
    w = jax.random.uniform(kw, (IN, OUT), minval=-bound, maxval=bound,
                           dtype=jnp.float32)
    b = jax.random.uniform(kb, (OUT,), minval=-bound, maxval=bound,
                           dtype=jnp.float32)

    out = net_forward(x, w, b)
    jax.block_until_ready(out)
    ref = jax.nn.softmax(x @ w + b, axis=-1)
    assert out.shape == (B, OUT)
    # approx=True reciprocal (EUP vrcp) trades a few ulps for a free slot.
    assert jnp.allclose(out, ref, atol=5e-3, rtol=1e-3)

    # Exercise the multi-tile grid + ragged (partial last tile) path.
    B2 = 1300
    x2 = jax.random.normal(kx2, (B2, IN), dtype=jnp.float32)
    out2 = net_forward(x2, w, b)
    jax.block_until_ready(out2)
    ref2 = jax.nn.softmax(x2 @ w + b, axis=-1)
    assert out2.shape == (B2, OUT)
    assert jnp.allclose(out2, ref2, atol=5e-3, rtol=1e-3)

    print("KERNEL_OK")
</pallas_src>

<mosaic_0001>
module attributes {stable_mosaic.version = 11 : i64} {
  func.func @net_kernel(%arg0: i32, %arg1: memref<1x1280xf32, #tpu.memory_space<vmem>>, %arg2: memref<1280x128xf32, #tpu.memory_space<vmem>>, %arg3: memref<1x1xf32, #tpu.memory_space<smem>>, %arg4: memref<1x128xf32, #tpu.memory_space<vmem>>, %arg5: memref<1x128xf32, #tpu.memory_space<vmem>>) attributes {dimension_semantics = [#tpu.dimension_semantics<parallel>], iteration_bounds = array<i64: 1>, scalar_prefetch = 0 : i64, scratch_operands = 0 : i64, tpu.core_type = #tpu.core_type<tc>, window_params = [{transform_indices = @transform_0, window_bounds = array<i64: 1, 1280>}, {pipeline_mode = #tpu.pipeline_mode<synchronous>, transform_indices = @transform_1, window_bounds = array<i64: 1280, 128>}, {transform_indices = @transform_2, window_bounds = array<i64: 1, 1>}, {transform_indices = @transform_3, window_bounds = array<i64: 1, 128>}, {transform_indices = @transform_4, window_bounds = array<i64: 1, 128>}]} {
    %c0 = arith.constant 0 : index
    %c0_0 = arith.constant 0 : index
    %0 = vector.load %arg1[%c0, %c0_0] : memref<1x1280xf32, #tpu.memory_space<vmem>>, vector<1x1280xf32>
    %c0_1 = arith.constant 0 : index
    %c0_2 = arith.constant 0 : index
    %1 = vector.load %arg2[%c0_1, %c0_2] : memref<1280x128xf32, #tpu.memory_space<vmem>>, vector<1280x128xf32>
    %cst = arith.constant dense<0.000000e+00> : vector<1x128xf32>
    %2 = tpu.matmul %0, %1, %cst {dimension_numbers = #tpu.dot_dimension_numbers<[1], [0], [0], [1], [0, 0, 1, 1], [], []>} : vector<1x1280xf32>, vector<1280x128xf32>, vector<1x128xf32> -> vector<1x128xf32>
    %c0_3 = arith.constant 0 : index
    %c0_4 = arith.constant 0 : index
    %3 = memref.load %arg3[%c0_3, %c0_4] : memref<1x1xf32, #tpu.memory_space<smem>>
    %4 = vector.broadcast %3 : f32 to vector<1x128xf32>
    %5 = arith.addf %2, %4 : vector<1x128xf32>
    %cst_5 = arith.constant 0.000000e+00 : f32
    %6 = vector.broadcast %cst_5 : f32 to vector<1x128xf32>
    %7 = arith.subf %6, %5 : vector<1x128xf32>
    %8 = math.exp %7 : vector<1x128xf32>
    %cst_6 = arith.constant 1.000000e+00 : f32
    %9 = vector.broadcast %cst_6 : f32 to vector<1x128xf32>
    %10 = arith.addf %9, %8 : vector<1x128xf32>
    %11 = tpu.reciprocal %10 {approx = true} : vector<1x128xf32> -> vector<1x128xf32>
    %cst_7 = arith.constant 1.000000e+00 : f32
    %12 = vector.broadcast %cst_7 : f32 to vector<1x128xf32>
    %13 = arith.subf %12, %11 : vector<1x128xf32>
    %c0_8 = arith.constant 0 : index
    %c0_9 = arith.constant 0 : index
    %14 = vector.load %arg4[%c0_8, %c0_9] : memref<1x128xf32, #tpu.memory_space<vmem>>, vector<1x128xf32>
    tpu.vector_store %arg4[%c0_8, %c0_9], %13 {strides = array<i32>} : memref<1x128xf32, #tpu.memory_space<vmem>>, vector<1x128xf32>,
    %c0_10 = arith.constant 0 : index
    %c0_11 = arith.constant 0 : index
    %15 = vector.load %arg5[%c0_10, %c0_11] : memref<1x128xf32, #tpu.memory_space<vmem>>, vector<1x128xf32>
    tpu.vector_store %arg5[%c0_10, %c0_11], %11 {strides = array<i32>} : memref<1x128xf32, #tpu.memory_space<vmem>>, vector<1x128xf32>,
    return
  }
  func.func @transform_0(%arg0: i32) -> (i32, i32) {
    %c0_i32 = arith.constant 0 : i32
    %c0_i32_0 = arith.constant 0 : i32
    return %arg0, %c0_i32 : i32, i32
  }
  func.func @transform_1(%arg0: i32) -> (i32, i32) {
    %c0_i32 = arith.constant 0 : i32
    %c0_i32_0 = arith.constant 0 : i32
    %c0_i32_1 = arith.constant 0 : i32
    return %c0_i32, %c0_i32_0 : i32, i32
  }
  func.func @transform_2(%arg0: i32) -> (i32, i32) {
    %c0_i32 = arith.constant 0 : i32
    %c0_i32_0 = arith.constant 0 : i32
    %c0_i32_1 = arith.constant 0 : i32
    return %c0_i32, %c0_i32_0 : i32, i32
  }
  func.func @transform_3(%arg0: i32) -> (i32, i32) {
    %c0_i32 = arith.constant 0 : i32
    %c0_i32_0 = arith.constant 0 : i32
    return %arg0, %c0_i32 : i32, i32
  }
  func.func @transform_4(%arg0: i32) -> (i32, i32) {
    %c0_i32 = arith.constant 0 : i32
    %c0_i32_0 = arith.constant 0 : i32
    return %arg0, %c0_i32 : i32, i32
  }
}

</mosaic_0001>

<bundles_post_ra>
// kernel: tpu_custom_call.1
= control target key start
LH: loop header
LB: loop body
LE: loop exit
PB: predicated region body
PF: predicated region fallthrough
CT: control target
= control target key end

     0   :  { %11 = vsyncpa [#allocation4], 0  ;;  %s1000_s0 = inlined_call_operand.hbm [shape: f32[1,1280], index: 0, kind: input, shape index: {}]   ;;  %s1001_s1 = inlined_call_operand.hbm [shape: f32[1280,128], index: 1, kind: input, shape index: {}]   ;;  %s1002_s2 = inlined_call_operand.<no memory space> [shape: f32[1,1], index: 2, kind: input, shape index: {}]   ;;  %s1003_s3 = inlined_call_operand.hbm [shape: f32[1,128], index: 3, kind: output, shape index: {0}]   ;;  %s1004_s4 = inlined_call_operand.hbm [shape: f32[1,128], index: 4, kind: output, shape index: {1}]  }
   0x1   :  { %12 = vsyncpa [#allocation7], 0 }
   0x2   :  { %13 = vsyncpa [#allocation5], 0 }
   0x3   :  { %14 = vsyncpa [#allocation10], 0  ;;  %s922_s15 = smov [#allocation3]   ;;  %s923_s17 = smov [#allocation6]  }
   0x4   :  { %s21_s16 = sshll.u32 %s922_s15, 4  ;;  %s30_s18 = sshll.u32 %s923_s17, 4  ;;  %s22_s16 = int_to_ptr.vmem [resolvable:$true] %s21_s16  ;;  %s31_s18 = int_to_ptr.vmem [resolvable:$true] %s30_s18 }
   0x5   :  { %s842_s19 = scalar_lea.vmem %s22_s16, 160  ;;  %p847_p1 = scmp.lt.s32.totalorder %s22_s16, %s22_s16 }
   0x6   :  { %p843_p0 = scmp.ne.s32.totalorder %s22_s16, %s842_s19  ;;  %p848_p2 = scmp.lt.s32.totalorder %s842_s19, %s842_s19 }
   0x8   :  { %p849_p3 = por %p848_p2, %p847_p1 }
   0xa   :  { %p850_p4 = pnand %p849_p3, %p843_p0 }
   0xc   :  { %853 = shalt.err (!%p850_p4)
}
   0xd   :  { %24 = dma.hbm_to_vmem [thread:$0]  %s1000_s0, 160, %s22_s16, [#allocation4]  }
   0xe   :  { %s862_s22 = scalar_lea.vmem %s31_s18, 20480  ;;  %p867_p6 = scmp.lt.s32.totalorder %s31_s18, %s31_s18 }
   0xf   :  { %p863_p5 = scmp.ne.s32.totalorder %s31_s18, %s862_s22  ;;  %p868_p7 = scmp.lt.s32.totalorder %s862_s22, %s862_s22 }
  0x11   :  { %p869_p8 = por %p868_p7, %p867_p6 }
  0x13   :  { %p870_p9 = pnand %p869_p8, %p863_p5 }
  0x15   :  { %873 = shalt.err (!%p870_p9)
}
  0x16   :  { %s924_s23 = smov 128   ;;  %s925_s24 = smov 8  }
  0x17   :  { %36 = dma.hbm_to_vmem [thread:$0]  %s1001_s1, 20480, %s31_s18, [#allocation7], %s924_s23, %s924_s23, %s925_s24  }
  0x18   :  { %914 = dma.done.wait [#allocation4], 160  }
  0x19   :  { %915 = vsyncadd [#allocation4], 4294967136 }
  0x1a   :  { %916 = dma.done.wait [#allocation7], 20480  }
  0x1b   :  { %917 = vsyncadd [#allocation7], 4294946816  ;;  %v78_v0 = vld [vmem:[#allocation6 + $0xf8] sm:$0xff]  ;;  %v77_v2 = vld [vmem:[#allocation6 + $0xf0] sm:$0xff]  ;;  %v211_v35 = vlaneseq  ;;  %s927_s28 = smov [#allocation8]  }
  0x1c   :  { %v62_v1 = vld [vmem:[#allocation6 + $0x78] sm:$0xff]  ;;  %649 = vmatprep.subr.mxu0 %v78_v0  ;;  %v61_v4 = vld [vmem:[#allocation6 + $0x70] sm:$0xff]  ;;  %v76_v6 = vld [vmem:[#allocation6 + $0xe8] sm:$0xff]  ;;  %s625_s29 = sshll.u32 %s927_s28, 4  ;;  %s626_s29 = int_to_ptr.vmem [resolvable:$true] %s625_s29 }
  0x1d   :  { %v110_v3 = vld [vmem:[#allocation6 + $0x1f8] sm:$0xff]  ;;  %650 = vmatpush3.msra.mxu0 %v62_v1  ;;  %v109_v7 = vld [vmem:[#allocation6 + $0x1f0] sm:$0xff]  ;;  %v60_v8 = vld [vmem:[#allocation6 + $0x68] sm:$0xff]  ;;  %v959_v44 = vshrl.u32 %v211_v35, 7 }
  0x1e   :  { %v94_v5 = vld [vmem:[#allocation6 + $0x178] sm:$0xff]  ;;  %684 = vmatprep.subr.mxu1 %v110_v3  ;;  %651 = vmatprep.subr.mxu0 %v77_v2  ;;  %v93_v9 = vld [vmem:[#allocation6 + $0x170] sm:$0xff]  ;;  %v108_v10 = vld [vmem:[#allocation6 + $0x1e8] sm:$0xff] }
  0x1f   :  { %685 = vmatpush3.msra.mxu1 %v94_v5  ;;  %652 = vmatpush3.msra.mxu0 %v61_v4  ;;  %v75_v11 = vld [vmem:[#allocation6 + $0xe0] sm:$0xff]  ;;  %v92_v12 = vld [vmem:[#allocation6 + $0x168] sm:$0xff]  ;;  %v74_v15 = vld [vmem:[#allocation6 + $0xd8] sm:$0xff]  ;;  %v217_v53 = vsub.s32 1, %v959_v44  ;;  %v213_v59 = vsub.s32 0, %v959_v44  ;;  %v225_v1 = vsub.s32 3, %v959_v44 }
  0x20   :  { %686 = vmatprep.subr.mxu1 %v109_v7  ;;  %653 = vmatprep.subr.mxu0 %v76_v6  ;;  %v59_v13 = vld [vmem:[#allocation6 + $0x60] sm:$0xff]  ;;  %v58_v17 = vld [vmem:[#allocation6 + $0x58] sm:$0xff]  ;;  %v73_v19 = vld [vmem:[#allocation6 + $0xd0] sm:$0xff]  ;;  %v221_v3 = vsub.s32 2, %v959_v44 }
  0x21   :  { %687 = vmatpush3.msra.mxu1 %v93_v9  ;;  %v107_v14 = vld [vmem:[#allocation6 + $0x1e0] sm:$0xff]  ;;  %654 = vmatpush3.msra.mxu0 %v60_v8  ;;  %v106_v18 = vld [vmem:[#allocation6 + $0x1d8] sm:$0xff]  ;;  %v57_v21 = vld [vmem:[#allocation6 + $0x50] sm:$0xff] }
  0x22   :  { %688 = vmatprep.subr.mxu1 %v108_v10  ;;  %v91_v16 = vld [vmem:[#allocation6 + $0x160] sm:$0xff]  ;;  %655 = vmatprep.subr.mxu0 %v75_v11  ;;  %v90_v20 = vld [vmem:[#allocation6 + $0x158] sm:$0xff]  ;;  %v105_v22 = vld [vmem:[#allocation6 + $0x1d0] sm:$0xff] }
  0x23   :  { %689 = vmatpush3.msra.mxu1 %v92_v12  ;;  %656 = vmatpush3.msra.mxu0 %v59_v13  ;;  %v72_v23 = vld [vmem:[#allocation6 + $0xc8] sm:$0xff]  ;;  %v89_v24 = vld [vmem:[#allocation6 + $0x150] sm:$0xff]  ;;  %v71_v27 = vld [vmem:[#allocation6 + $0xc0] sm:$0xff] }
  0x24   :  { %690 = vmatprep.subr.mxu1 %v107_v14  ;;  %657 = vmatprep.subr.mxu0 %v74_v15  ;;  %v56_v25 = vld [vmem:[#allocation6 + $0x48] sm:$0xff]  ;;  %v55_v29 = vld [vmem:[#allocation6 + $0x40] sm:$0xff]  ;;  %v70_v31 = vld [vmem:[#allocation6 + $0xb8] sm:$0xff] }
  0x25   :  { %691 = vmatpush3.msra.mxu1 %v91_v16  ;;  %658 = vmatpush3.msra.mxu0 %v58_v17  ;;  %v104_v26 = vld [vmem:[#allocation6 + $0x1c8] sm:$0xff]  ;;  %v103_v30 = vld [vmem:[#allocation6 + $0x1c0] sm:$0xff]  ;;  %v54_v33 = vld [vmem:[#allocation6 + $0x38] sm:$0xff] }
  0x26   :  { %692 = vmatprep.subr.mxu1 %v106_v18  ;;  %659 = vmatprep.subr.mxu0 %v73_v19  ;;  %v88_v28 = vld [vmem:[#allocation6 + $0x148] sm:$0xff]  ;;  %v87_v32 = vld [vmem:[#allocation6 + $0x140] sm:$0xff]  ;;  %v102_v34 = vld [vmem:[#allocation6 + $0x1b8] sm:$0xff] }
  0x27   :  { %693 = vmatpush3.msra.mxu1 %v90_v20  ;;  %660 = vmatpush3.msra.mxu0 %v57_v21  ;;  %v69_v36 = vld [vmem:[#allocation6 + $0xb0] sm:$0xff]  ;;  %v86_v37 = vld [vmem:[#allocation6 + $0x138] sm:$0xff]  ;;  %v68_v40 = vld [vmem:[#allocation6 + $0xa8] sm:$0xff] }
  0x28   :  { %694 = vmatprep.subr.mxu1 %v105_v22  ;;  %661 = vmatprep.subr.mxu0 %v72_v23  ;;  %v53_v38 = vld [vmem:[#allocation6 + $0x30] sm:$0xff]  ;;  %v52_v42 = vld [vmem:[#allocation6 + $0x28] sm:$0xff]  ;;  %v67_v45 = vld [vmem:[#allocation6 + $0xa0] sm:$0xff] }
  0x29   :  { %695 = vmatpush3.msra.mxu1 %v89_v24  ;;  %662 = vmatpush3.msra.mxu0 %v56_v25  ;;  %v101_v39 = vld [vmem:[#allocation6 + $0x1b0] sm:$0xff]  ;;  %v100_v43 = vld [vmem:[#allocation6 + $0x1a8] sm:$0xff]  ;;  %v51_v47 = vld [vmem:[#allocation6 + $0x20] sm:$0xff] }
  0x2a   :  { %696 = vmatprep.subr.mxu1 %v104_v26  ;;  %663 = vmatprep.subr.mxu0 %v71_v27  ;;  %v85_v41 = vld [vmem:[#allocation6 + $0x130] sm:$0xff]  ;;  %v84_v46 = vld [vmem:[#allocation6 + $0x128] sm:$0xff]  ;;  %v99_v48 = vld [vmem:[#allocation6 + $0x1a0] sm:$0xff] }
  0x2b   :  { %697 = vmatpush3.msra.mxu1 %v88_v28  ;;  %664 = vmatpush3.msra.mxu0 %v55_v29  ;;  %v66_v49 = vld [vmem:[#allocation6 + $0x98] sm:$0xff]  ;;  %v83_v50 = vld [vmem:[#allocation6 + $0x120] sm:$0xff]  ;;  %v65_v54 = vld [vmem:[#allocation6 + $0x90] sm:$0xff] }
  0x2c   :  { %698 = vmatprep.subr.mxu1 %v103_v30  ;;  %665 = vmatprep.subr.mxu0 %v70_v31  ;;  %v50_v51 = vld [vmem:[#allocation6 + $0x18] sm:$0xff]  ;;  %v49_v57 = vld [vmem:[#allocation6 + $0x10] sm:$0xff]  ;;  %v64_v60 = vld [vmem:[#allocation6 + $0x88] sm:$0xff] }
  0x2d   :  { %699 = vmatpush3.msra.mxu1 %v87_v32  ;;  %666 = vmatpush3.msra.mxu0 %v54_v33  ;;  %v98_v52 = vld [vmem:[#allocation6 + $0x198] sm:$0xff]  ;;  %v97_v58 = vld [vmem:[#allocation6 + $0x190] sm:$0xff]  ;;  %v48_v62 = vld [vmem:[#allocation6 + $0x8] sm:$0xff] }
  0x2e   :  { %700 = vmatprep.subr.mxu1 %v102_v34  ;;  %667 = vmatprep.subr.mxu0 %v69_v36  ;;  %v82_v55 = vld [vmem:[#allocation6 + $0x118] sm:$0xff]  ;;  %v81_v61 = vld [vmem:[#allocation6 + $0x110] sm:$0xff]  ;;  %v96_v63 = vld [vmem:[#allocation6 + $0x188] sm:$0xff] }
  0x2f   :  { %701 = vmatpush3.msra.mxu1 %v86_v37  ;;  %668 = vmatpush3.msra.mxu0 %v53_v38  ;;  %v962_v56 = vld [vmem:[#allocation3] sm:$0xff]  ;;  %v63_v2 = vld [vmem:[#allocation6 + $0x80] sm:$0xff]  ;;  %v80_v5 = vld [vmem:[#allocation6 + $0x108] sm:$0xff] }
  0x30   :  { %702 = vmatprep.subr.mxu1 %v101_v39  ;;  %669 = vmatprep.subr.mxu0 %v68_v40  ;;  %v218_v0 = vrot.slane %v962_v56, %v217_v53  ;;  %v47_v4 = vld [vmem:[#allocation6] sm:$0xff]  ;;  %v214_v6 = vrot.slane %v962_v56, %v213_v59  ;;  %v142_v8 = vld [vmem:[#allocation6 + $0x2f8] sm:$0xff]  ;;  %v226_v10 = vrot.slane %v962_v56, %v225_v1  ;;  %v141_v13 = vld [vmem:[#allocation6 + $0x2f0] sm:$0xff] }
  0x31   :  { %703 = vmatpush3.msra.mxu1 %v85_v41  ;;  %670 = vmatpush3.msra.mxu0 %v52_v42  ;;  %v95_v7 = vld [vmem:[#allocation6 + $0x180] sm:$0xff]  ;;  %v126_v11 = vld [vmem:[#allocation6 + $0x278] sm:$0xff]  ;;  %v222_v12 = vrot.slane %v962_v56, %v221_v3  ;;  %v125_v15 = vld [vmem:[#allocation6 + $0x270] sm:$0xff] }
  0x32   :  { %704 = vmatprep.subr.mxu1 %v100_v43  ;;  %671 = vmatprep.subr.mxu0 %v67_v45  ;;  %v79_v9 = vld [vmem:[#allocation6 + $0x100] sm:$0xff]  ;;  %v174_v14 = vld [vmem:[#allocation6 + $0x3f8] sm:$0xff]  ;;  %v140_v17 = vld [vmem:[#allocation6 + $0x2e8] sm:$0xff] }
  0x33   :  { %705 = vmatpush3.msra.mxu1 %v84_v46  ;;  %672 = vmatpush3.msra.mxu0 %v51_v47  ;;  %v158_v16 = vld [vmem:[#allocation6 + $0x378] sm:$0xff]  ;;  %v173_v18 = vld [vmem:[#allocation6 + $0x3f0] sm:$0xff]  ;;  %v124_v19 = vld [vmem:[#allocation6 + $0x268] sm:$0xff] }
  0x34   :  { %706 = vmatprep.subr.mxu1 %v99_v48  ;;  %673 = vmatprep.subr.mxu0 %v66_v49  ;;  %v157_v20 = vld [vmem:[#allocation6 + $0x370] sm:$0xff]  ;;  %v139_v21 = vld [vmem:[#allocation6 + $0x2e0] sm:$0xff]  ;;  %v172_v22 = vld [vmem:[#allocation6 + $0x3e8] sm:$0xff] }
  0x35   :  { %707 = vmatpush3.msra.mxu1 %v83_v50  ;;  %674 = vmatpush3.msra.mxu0 %v50_v51  ;;  %v123_v23 = vld [vmem:[#allocation6 + $0x260] sm:$0xff]  ;;  %v156_v24 = vld [vmem:[#allocation6 + $0x368] sm:$0xff]  ;;  %v138_v25 = vld [vmem:[#allocation6 + $0x2d8] sm:$0xff] }
  0x36   :  { %708 = vmatprep.subr.mxu1 %v98_v52  ;;  %675 = vmatprep.subr.mxu0 %v65_v54  ;;  %v171_v26 = vld [vmem:[#allocation6 + $0x3e0] sm:$0xff]  ;;  %v122_v27 = vld [vmem:[#allocation6 + $0x258] sm:$0xff]  ;;  %v137_v29 = vld [vmem:[#allocation6 + $0x2d0] sm:$0xff] }
  0x37   :  { %709 = vmatpush3.msra.mxu1 %v82_v55  ;;  %676 = vmatpush3.msra.mxu0 %v49_v57  ;;  %v155_v28 = vld [vmem:[#allocation6 + $0x360] sm:$0xff]  ;;  %v170_v30 = vld [vmem:[#allocation6 + $0x3d8] sm:$0xff]  ;;  %v121_v31 = vld [vmem:[#allocation6 + $0x250] sm:$0xff] }
  0x38   :  { %710 = vmatprep.subr.mxu1 %v97_v58  ;;  %677 = vmatprep.subr.mxu0 %v64_v60  ;;  %v154_v32 = vld [vmem:[#allocation6 + $0x358] sm:$0xff]  ;;  %v136_v33 = vld [vmem:[#allocation6 + $0x2c8] sm:$0xff]  ;;  %v169_v34 = vld [vmem:[#allocation6 + $0x3d0] sm:$0xff] }
  0x39   :  { %711 = vmatpush3.msra.mxu1 %v81_v61  ;;  %678 = vmatpush3.msra.mxu0 %v48_v62  ;;  %v120_v35 = vld [vmem:[#allocation6 + $0x248] sm:$0xff]  ;;  %v153_v36 = vld [vmem:[#allocation6 + $0x350] sm:$0xff]  ;;  %v135_v37 = vld [vmem:[#allocation6 + $0x2c0] sm:$0xff] }
  0x3a   :  { %712 = vmatprep.subr.mxu1 %v96_v63  ;;  %679 = vmatprep.subr.mxu0 %v63_v2  ;;  %v168_v38 = vld [vmem:[#allocation6 + $0x3c8] sm:$0xff]  ;;  %v119_v39 = vld [vmem:[#allocation6 + $0x240] sm:$0xff]  ;;  %v134_v41 = vld [vmem:[#allocation6 + $0x2b8] sm:$0xff] }
  0x3b   :  { %325 = vmatprep.mubr.f32.mxu0 %v218_v0  ;;  %680 = vmatpush3.msra.mxu0 %v47_v4  ;;  %v152_v40 = vld [vmem:[#allocation6 + $0x348] sm:$0xff]  ;;  %v167_v42 = vld [vmem:[#allocation6 + $0x3c0] sm:$0xff]  ;;  %v118_v43 = vld [vmem:[#allocation6 + $0x238] sm:$0xff]  ;;  %v233_v4 = vsub.s32 5, %v959_v44 }
  0x3c   :  { %713 = vmatpush3.msra.mxu1 %v80_v5  ;;  %326 = vmatmul.mubr.f32.vlgmr.msra.gmra.mxu0 %v214_v6  ;;  %v151_v45 = vld [vmem:[#allocation6 + $0x340] sm:$0xff]  ;;  %v133_v46 = vld [vmem:[#allocation6 + $0x2b0] sm:$0xff]  ;;  %v166_v47 = vld [vmem:[#allocation6 + $0x3b8] sm:$0xff] }
  0x3d   :  { %714 = vmatprep.subr.mxu1 %v95_v7  ;;  %719 = vmatprep.subr.mxu0 %v142_v8  ;;  %v117_v48 = vld [vmem:[#allocation6 + $0x230] sm:$0xff]  ;;  %v150_v49 = vld [vmem:[#allocation6 + $0x338] sm:$0xff]  ;;  %v132_v50 = vld [vmem:[#allocation6 + $0x2a8] sm:$0xff]  ;;  %v229_v7 = vsub.s32 4, %v959_v44 }
  0x3e   :  { %715 = vmatpush3.msra.mxu1 %v79_v9  ;;  %395 = vmatprep.mubr.f32.mxu1 %v226_v10  ;;  %v165_v51 = vld [vmem:[#allocation6 + $0x3b0] sm:$0xff]  ;;  %v116_v52 = vld [vmem:[#allocation6 + $0x228] sm:$0xff]  ;;  %v131_v55 = vld [vmem:[#allocation6 + $0x2a0] sm:$0xff] }
  0x3f   :  { %720 = vmatpush3.msra.mxu0 %v126_v11  ;;  %396 = vmatmul.mubr.f32.vlgmr.msra.gmra.mxu1 %v222_v12  ;;  %v149_v54 = vld [vmem:[#allocation6 + $0x330] sm:$0xff]  ;;  %v164_v57 = vld [vmem:[#allocation6 + $0x3a8] sm:$0xff]  ;;  %v115_v58 = vld [vmem:[#allocation6 + $0x220] sm:$0xff]  ;;  %v241_v12 = vsub.s32 7, %v959_v44 }
  0x40   :  { %721 = vmatprep.subr.mxu0 %v141_v13  ;;  %754 = vmatprep.subr.mxu1 %v174_v14  ;;  %v148_v60 = vld [vmem:[#allocation6 + $0x328] sm:$0xff]  ;;  %v130_v61 = vld [vmem:[#allocation6 + $0x298] sm:$0xff]  ;;  %v163_v62 = vld [vmem:[#allocation6 + $0x3a0] sm:$0xff] }
  0x41   :  { %722 = vmatpush3.msra.mxu0 %v125_v15  ;;  %755 = vmatpush3.msra.mxu1 %v158_v16  ;;  %v114_v63 = vld [vmem:[#allocation6 + $0x218] sm:$0xff]  ;;  %v147_v0 = vld [vmem:[#allocation6 + $0x320] sm:$0xff]  ;;  %v129_v1 = vld [vmem:[#allocation6 + $0x290] sm:$0xff]  ;;  %v234_v15 = vrot.slane %v962_v56, %v233_v4  ;;  %v237_v16 = vsub.s32 6, %v959_v44 }
  0x42   :  { %723 = vmatprep.subr.mxu0 %v140_v17  ;;  %756 = vmatprep.subr.mxu1 %v173_v18  ;;  %v162_v2 = vld [vmem:[#allocation6 + $0x398] sm:$0xff]  ;;  %v113_v3 = vld [vmem:[#allocation6 + $0x210] sm:$0xff]  ;;  %v128_v6 = vld [vmem:[#allocation6 + $0x288] sm:$0xff]  ;;  %v230_v18 = vrot.slane %v962_v56, %v229_v7 }
  0x43   :  { %724 = vmatpush3.msra.mxu0 %v124_v19  ;;  %757 = vmatpush3.msra.mxu1 %v157_v20  ;;  %v146_v5 = vld [vmem:[#allocation6 + $0x318] sm:$0xff]  ;;  %v161_v8 = vld [vmem:[#allocation6 + $0x390] sm:$0xff]  ;;  %v112_v9 = vld [vmem:[#allocation6 + $0x208] sm:$0xff] }
  0x44   :  { %725 = vmatprep.subr.mxu0 %v139_v21  ;;  %758 = vmatprep.subr.mxu1 %v172_v22  ;;  %v145_v10 = vld [vmem:[#allocation6 + $0x310] sm:$0xff]  ;;  %v127_v11 = vld [vmem:[#allocation6 + $0x280] sm:$0xff]  ;;  %v160_v13 = vld [vmem:[#allocation6 + $0x388] sm:$0xff] }
  0x45   :  { %726 = vmatpush3.msra.mxu0 %v123_v23  ;;  %759 = vmatpush3.msra.mxu1 %v156_v24  ;;  %v111_v14 = vld [vmem:[#allocation6 + $0x200] sm:$0xff]  ;;  %v144_v17 = vld [vmem:[#allocation6 + $0x308] sm:$0xff]  ;;  %v981_v20 = vld [vmem:[#allocation3 + $0x8] sm:$0x3]  ;;  %v242_v23 = vrot.slane %v962_v56, %v241_v12 }
  0x46   :  { %727 = vmatprep.subr.mxu0 %v138_v25  ;;  %760 = vmatprep.subr.mxu1 %v171_v26  ;;  %v159_v19 = vld [vmem:[#allocation6 + $0x380] sm:$0xff]  ;;  %v206_v21 = vld [vmem:[#allocation6 + $0x4f8] sm:$0xff]  ;;  %v238_v25 = vrot.slane %v962_v56, %v237_v16  ;;  %v205_v26 = vld [vmem:[#allocation6 + $0x4f0] sm:$0xff] }
  0x47   :  { %728 = vmatpush3.msra.mxu0 %v122_v27  ;;  %761 = vmatpush3.msra.mxu1 %v155_v28  ;;  %v143_v22 = vld [vmem:[#allocation6 + $0x300] sm:$0xff]  ;;  %v190_v24 = vld [vmem:[#allocation6 + $0x478] sm:$0xff]  ;;  %v250_v27 = vrot.slane %v981_v20, %v217_v53  ;;  %v189_v28 = vld [vmem:[#allocation6 + $0x470] sm:$0xff] }
  0x48   :  { %729 = vmatprep.subr.mxu0 %v137_v29  ;;  %762 = vmatprep.subr.mxu1 %v170_v30  ;;  %v204_v29 = vld [vmem:[#allocation6 + $0x4e8] sm:$0xff]  ;;  %v187_v56 = vld [vmem:[#allocation6 + $0x460] sm:$0xff]  ;;  %v201_v53 = vld [vmem:[#allocation6 + $0x4d0] sm:$0xff] }
  0x49   :  { %730 = vmatpush3.msra.mxu0 %v121_v31  ;;  %763 = vmatpush3.msra.mxu1 %v154_v32  ;;  %v188_v30 = vld [vmem:[#allocation6 + $0x468] sm:$0xff]  ;;  %v203_v31 = vld [vmem:[#allocation6 + $0x4e0] sm:$0xff]  ;;  %v202_v32 = vld [vmem:[#allocation6 + $0x4d8] sm:$0xff] }
  0x4a   :  { %731 = vmatprep.subr.mxu0 %v136_v33  ;;  %764 = vmatprep.subr.mxu1 %v169_v34  ;;  %v186_v33 = vld [vmem:[#allocation6 + $0x458] sm:$0xff]  ;;  %v185_v34 = vld [vmem:[#allocation6 + $0x450] sm:$0xff] }
  0x4b   :  { %732 = vmatpush3.msra.mxu0 %v120_v35  ;;  %765 = vmatpush3.msra.mxu1 %v153_v36  ;;  %v200_v35 = vld [vmem:[#allocation6 + $0x4c8] sm:$0xff] }
  0x4c   :  { %733 = vmatprep.subr.mxu0 %v135_v37  ;;  %766 = vmatprep.subr.mxu1 %v168_v38  ;;  %v184_v36 = vld [vmem:[#allocation6 + $0x448] sm:$0xff]  ;;  %v199_v37 = vld [vmem:[#allocation6 + $0x4c0] sm:$0xff] }
  0x4d   :  { %734 = vmatpush3.msra.mxu0 %v119_v39  ;;  %767 = vmatpush3.msra.mxu1 %v152_v40  ;;  %v183_v38 = vld [vmem:[#allocation6 + $0x440] sm:$0xff]  ;;  %v198_v39 = vld [vmem:[#allocation6 + $0x4b8] sm:$0xff] }
  0x4e   :  { %735 = vmatprep.subr.mxu0 %v134_v41  ;;  %768 = vmatprep.subr.mxu1 %v167_v42  ;;  %v182_v40 = vld [vmem:[#allocation6 + $0x438] sm:$0xff]  ;;  %v197_v41 = vld [vmem:[#allocation6 + $0x4b0] sm:$0xff] }
  0x4f   :  { %736 = vmatpush3.msra.mxu0 %v118_v43  ;;  %769 = vmatpush3.msra.mxu1 %v151_v45  ;;  %v181_v42 = vld [vmem:[#allocation6 + $0x430] sm:$0xff]  ;;  %v196_v43 = vld [vmem:[#allocation6 + $0x4a8] sm:$0xff] }
  0x50   :  { %737 = vmatprep.subr.mxu0 %v133_v46  ;;  %770 = vmatprep.subr.mxu1 %v166_v47  ;;  %v180_v45 = vld [vmem:[#allocation6 + $0x428] sm:$0xff]  ;;  %v195_v46 = vld [vmem:[#allocation6 + $0x4a0] sm:$0xff] }
  0x51   :  { %738 = vmatpush3.msra.mxu0 %v117_v48  ;;  %771 = vmatpush3.msra.mxu1 %v150_v49  ;;  %v179_v47 = vld [vmem:[#allocation6 + $0x420] sm:$0xff]  ;;  %v194_v48 = vld [vmem:[#allocation6 + $0x498] sm:$0xff] }
  0x52   :  { %739 = vmatprep.subr.mxu0 %v132_v50  ;;  %772 = vmatprep.subr.mxu1 %v165_v51  ;;  %v178_v49 = vld [vmem:[#allocation6 + $0x418] sm:$0xff]  ;;  %v193_v50 = vld [vmem:[#allocation6 + $0x490] sm:$0xff] }
  0x53   :  { %740 = vmatpush3.msra.mxu0 %v116_v52  ;;  %773 = vmatpush3.msra.mxu1 %v149_v54  ;;  %v177_v51 = vld [vmem:[#allocation6 + $0x410] sm:$0xff]  ;;  %v192_v52 = vld [vmem:[#allocation6 + $0x488] sm:$0xff] }
  0x54   :  { %741 = vmatprep.subr.mxu0 %v131_v55  ;;  %774 = vmatprep.subr.mxu1 %v164_v57  ;;  %v176_v54 = vld [vmem:[#allocation6 + $0x408] sm:$0xff]  ;;  %v191_v55 = vld [vmem:[#allocation6 + $0x480] sm:$0xff] }
  0x55   :  { %742 = vmatpush3.msra.mxu0 %v115_v58  ;;  %775 = vmatpush3.msra.mxu1 %v148_v60  ;;  %v175_v57 = vld [vmem:[#allocation6 + $0x400] sm:$0xff]  ;;  %v246_v58 = vrot.slane %v981_v20, %v213_v59 }
  0x56   :  { %743 = vmatprep.subr.mxu0 %v130_v61  ;;  %776 = vmatprep.subr.mxu1 %v163_v62 }
  0x57   :  { %744 = vmatpush3.msra.mxu0 %v114_v63  ;;  %777 = vmatpush3.msra.mxu1 %v147_v0 }
  0x58   :  { %745 = vmatprep.subr.mxu0 %v129_v1  ;;  %778 = vmatprep.subr.mxu1 %v162_v2  ;;  %v208_v1 = vstv %s1002_s2  ;;  %s926_s2 = smov [#allocation9]  }
  0x59   :  { %746 = vmatpush3.msra.mxu0 %v113_v3  ;;  %779 = vmatpush3.msra.mxu1 %v146_v5  ;;  %s635_s27 = sshll.u32 %s926_s2, 4  ;;  %s636_s27 = int_to_ptr.vmem [resolvable:$true] %s635_s27 }
  0x5a   :  { %747 = vmatprep.subr.mxu0 %v128_v6  ;;  %780 = vmatprep.subr.mxu1 %v161_v8  ;;  %s874_s30 = scalar_lea.vmem %s636_s27, 16  ;;  %s878_s5 = scalar_lea.vmem %s636_s27, 32 }
  0x5b   :  { %748 = vmatpush3.msra.mxu0 %v112_v9  ;;  %781 = vmatpush3.msra.mxu1 %v145_v10  ;;  %p875_p10 = scmp.ne.s32.totalorder %s636_s27, %s874_s30  ;;  %p879_p11 = scmp.lt.s32.totalorder %s636_s27, %s636_s27 }
  0x5c   :  { %749 = vmatprep.subr.mxu0 %v127_v11  ;;  %782 = vmatprep.subr.mxu1 %v160_v13  ;;  %p880_p12 = scmp.lt.s32.totalorder %s878_s5, %s874_s30 }
  0x5d   :  { %750 = vmatpush3.msra.mxu0 %v111_v14  ;;  %465 = vmatprep.mubr.f32.mxu0 %v234_v15 }
  0x5e   :  { %783 = vmatpush3.msra.mxu1 %v144_v17  ;;  %466 = vmatmul.mubr.f32.vlgmr.msra.gmra.mxu0 %v230_v18  ;;  %p881_p13 = por %p880_p12, %p879_p11 }
  0x5f   :  { %784 = vmatprep.subr.mxu1 %v159_v19  ;;  %789 = vmatprep.subr.mxu0 %v206_v21 }
  0x60   :  { %785 = vmatpush3.msra.mxu1 %v143_v22  ;;  %535 = vmatprep.mubr.f32.mxu1 %v242_v23  ;;  %p882_p0 = pnand %p881_p13, %p875_p10 }
  0x61   :  { %790 = vmatpush3.msra.mxu0 %v190_v24  ;;  %536 = vmatmul.mubr.f32.vlgmr.msra.gmra.mxu1 %v238_v25 }
  0x62   :  { %791 = vmatprep.subr.mxu0 %v205_v26  ;;  %605 = vmatprep.mubr.f32.mxu0 %v250_v27 }
  0x63   :  { %792 = vmatpush3.msra.mxu0 %v189_v28 }
  0x64   :  { %793 = vmatprep.subr.mxu0 %v204_v29 }
  0x65   :  { %794 = vmatpush3.msra.mxu0 %v188_v30 }
  0x66   :  { %795 = vmatprep.subr.mxu0 %v203_v31 }
  0x67   :  { %796 = vmatpush3.msra.mxu0 %v187_v56 }
  0x68   :  { %797 = vmatprep.subr.mxu0 %v202_v32 }
  0x69   :  { %798 = vmatpush3.msra.mxu0 %v186_v33 }
  0x6a   :  { %799 = vmatprep.subr.mxu0 %v201_v53 }
  0x6b   :  { %800 = vmatpush3.msra.mxu0 %v185_v34 }
  0x6c   :  { %801 = vmatprep.subr.mxu0 %v200_v35 }
  0x6d   :  { %802 = vmatpush3.msra.mxu0 %v184_v36 }
  0x6e   :  { %803 = vmatprep.subr.mxu0 %v199_v37 }
  0x6f   :  { %804 = vmatpush3.msra.mxu0 %v183_v38 }
  0x70   :  { %805 = vmatprep.subr.mxu0 %v198_v39 }
  0x71   :  { %806 = vmatpush3.msra.mxu0 %v182_v40 }
  0x72   :  { %807 = vmatprep.subr.mxu0 %v197_v41 }
  0x73   :  { %808 = vmatpush3.msra.mxu0 %v181_v42 }
  0x74   :  { %809 = vmatprep.subr.mxu0 %v196_v43 }
  0x75   :  { %810 = vmatpush3.msra.mxu0 %v180_v45 }
  0x76   :  { %811 = vmatprep.subr.mxu0 %v195_v46 }
  0x77   :  { %812 = vmatpush3.msra.mxu0 %v179_v47 }
  0x78   :  { %813 = vmatprep.subr.mxu0 %v194_v48 }
  0x79   :  { %814 = vmatpush3.msra.mxu0 %v178_v49 }
  0x7a   :  { %815 = vmatprep.subr.mxu0 %v193_v50 }
  0x7b   :  { %816 = vmatpush3.msra.mxu0 %v177_v51 }
  0x7c   :  { %817 = vmatprep.subr.mxu0 %v192_v52 }
  0x7d   :  { %818 = vmatpush3.msra.mxu0 %v176_v54 }
  0x7e   :  { %819 = vmatprep.subr.mxu0 %v191_v55 }
  0x7f   :  { %820 = vmatpush3.msra.mxu0 %v175_v57 }
  0x80   :  { %606 = vmatmul.mubr.f32.vlgmr.msra.gmra.mxu0 %v246_v58 }
  0xfc   :  { %v681_v60 = vpop.f32.mrf.mxu0 }
  0xfe   :  { %v682_v61 = vpop.f32.mrf.mxu0 }
  0xff   :  { %v716_v62 = vpop.f32.mrf.mxu1  ;;  %v683_v0 = vadd.f32 %v682_v61, %v681_v60 }
 0x101   :  { %v717_v2 = vpop.f32.mrf.mxu1  ;;  %v328_v5 = vadd.f32 %v683_v0, %v208_v1 }
 0x102   :  { %v718_v44 = vadd.f32 %v717_v2, %v716_v62 }
 0x104   :  { %v398_v7 = vadd.f32 %v718_v44, %v328_v5 }
 0x11e   :  { %v751_v63 = vpop.f32.mrf.mxu0 }
 0x120   :  { %v752_v3 = vpop.f32.mrf.mxu0 }
 0x121   :  { %v786_v4 = vpop.f32.mrf.mxu1  ;;  %v753_v6 = vadd.f32 %v752_v3, %v751_v63 }
 0x123   :  { %v787_v59 = vpop.f32.mrf.mxu1  ;;  %v468_v8 = vadd.f32 %v753_v6, %v398_v7 }
 0x124   :  { %v788_v9 = vadd.f32 %v787_v59, %v786_v4 }
 0x126   :  { %v538_v12 = vadd.f32 %v788_v9, %v468_v8 }
 0x140   :  { %v821_v10 = vpop.f32.mrf.mxu0 }
 0x142   :  { %v822_v11 = vpop.f32.mrf.mxu0 }
 0x143   :  { %v823_v13 = vadd.f32 %v822_v11, %v821_v10 }
 0x145   :  { %v608_v14 = vadd.f32 %v823_v13, %v538_v12 }
 0x147   :  { %v611_v15 = vsub.f32 0.0, %v608_v14 }
 0x149   :  { %v612_v16 = vmul.f32 1.442695, %v611_v15 }
 0x14b   :  { %830 = vpow2.f32 %v612_v16 }
 0x158   :  { %v831_v17 = vpop.eup %830 }
 0x159   :  { %v614_v18 = vadd.f32 1.0, %v831_v17 }
 0x15b   :  { %832 = vrcp.f32 %v614_v18 }
 0x168   :  { %v833_v19 = vpop.eup %832 }
 0x169   :  { %618 = vst [vmem:[#allocation9] sm:$0x1] %v833_v19  ;;  %v616_v20 = vsub.f32 1.0, %v833_v19 }
 0x16a   :  { %885 = shalt.err (!%p882_p0)
}
 0x16b   :  { %638 = dma.vmem_to_hbm [thread:$0]  %s636_s27, 16, %s1004_s4, [#allocation10]   ;;  %617 = vst [vmem:[#allocation8] sm:$0x1] %v616_v20 }
 0x16c   :  { %s894_s8 = scalar_lea.vmem %s626_s29, 16  ;;  %s898_s9 = scalar_lea.vmem %s626_s29, 32 }
 0x16d   :  { %p895_p1 = scmp.ne.s32.totalorder %s626_s29, %s894_s8  ;;  %p899_p2 = scmp.lt.s32.totalorder %s626_s29, %s626_s29 }
 0x16e   :  { %p900_p3 = scmp.lt.s32.totalorder %s898_s9, %s894_s8 }
 0x170   :  { %p901_p4 = por %p900_p3, %p899_p2 }
 0x172   :  { %p902_p5 = pnand %p901_p4, %p895_p1 }
 0x174   :  { %905 = shalt.err (!%p902_p5)
}
 0x175   :  { %628 = dma.vmem_to_hbm [thread:$0]  %s626_s29, 16, %s1003_s3, [#allocation5]  }
 0x176   :  { %918 = dma.done.wait [#allocation5], 16  }
 0x177   :  { %919 = vsyncadd [#allocation5], 4294967280 }
 0x178   :  { %920 = dma.done.wait [#allocation10], 16  }
 0x179   :  { %921 = vsyncadd [#allocation10], 4294967280 }
 0x17a   :  { %645 = vsyncpa [#allocation4], 1 }
 0x17b   :  { %646 = vsyncpa [#allocation7], 1 }
 0x17c   :  { %647 = vsyncpa [#allocation5], 1 }
 0x17d   :  { %648 = vsyncpa [#allocation10], 1 }

</bundles_post_ra>
